<compile_context>
chip_gen: v7x
topology: tpu7x:2x2x1
jax: 0.10.0
libtpu: 0.0.40
codegen_flags: <defaults>
</compile_context>

<pallas_src>
import jax
import jax.numpy as jnp
from jax import lax
from jax.experimental import pallas as pl
from jax.experimental.pallas import tpu as pltpu


# ----------------------------- Pallas kernel -------------------------------
def _qmatmul_kernel(x_ref, w_ref, s_ref, o_ref):
    # x_ref : [tm, tk] f32/bf16    w_ref : [tn, tk] int8 (weight kept [N, K])
    # s_ref : [1, tn]  f32         o_ref : [tm, tn] f32 (doubles as accumulator)
    k = pl.program_id(2)

    @pl.when(k == 0)
    def _init():
        o_ref[...] = jnp.zeros_like(o_ref)

    x = x_ref[...].astype(jnp.bfloat16)       # no-op if already bf16
    w = w_ref[...].astype(jnp.bfloat16)       # in-register dequant int8 -> bf16
    # Contract on K (last axis of both operands): MXU matmul with "transposed
    # RHS" semantics, so no transposed weight copy is ever created.
    o_ref[...] += lax.dot_general(
        x, w,
        dimension_numbers=(((1,), (1,)), ((), ())),
        preferred_element_type=jnp.float32)

    @pl.when(k == pl.num_programs(2) - 1)
    def _finalize():
        # Per-output-channel scale applied exactly once, on the f32 accumulator.
        o_ref[...] *= s_ref[...]


def _choose_tiles(B, N, K, tm, tn, tk):
    """Tile selection per perf review: megacore-friendly N blocks, >=2 K steps."""
    # M axis: keep >=128 rows when the batch allows (hides the int8->bf16
    # dequant VPU cost under the MXU); otherwise use the whole (small) batch.
    tm = min(tm, B)
    # N axis: prefer >=2 blocks so v7x's two TensorCores both get work, while
    # keeping tiles lane-dense (multiple of 128) or full-N.
    if N >= 256 and N % 256 == 0:
        tn = min(tn, N // 2)
    else:
        tn = min(tn, N)
    # K axis: prefer >=2 steps so the weight DMA double-buffer overlaps compute.
    if K >= 256 and K % 256 == 0:
        tk = min(tk, K // 2)
    else:
        tk = min(tk, K)
    return tm, tn, tk


def quantized_linear(x, w_int, scale, *, tm=256, tn=512, tk=1024):
    """x: [B, K] float, w_int: [N, K] int8, scale: [N] float -> [B, N] f32."""
    B, K = x.shape
    N, K2 = w_int.shape
    assert K == K2, "weight/activation inner-dim mismatch"

    tm, tn, tk = _choose_tiles(B, N, K, tm, tn, tk)
    assert B % tm == 0 and N % tn == 0 and K % tk == 0, (
        "shapes must be divisible by the chosen tile sizes "
        f"(B={B}, N={N}, K={K}, tm={tm}, tn={tn}, tk={tk})")
    # Keep the output store path lane-dense / unmasked.
    assert (tn % 128 == 0) or (tn == N)
    assert (tk % 128 == 0) or (tk == K)
    assert (tm % 8 == 0) or (tm == B)

    grid = (B // tm, N // tn, K // tk)
    n_steps_k = K // tk
    n_blocks_n = N // tn

    # Cast x in the wrapper only when the kernel re-reads it enough times
    # (x is streamed N/tn times); otherwise cast in-kernel and avoid an extra
    # un-hidden XLA pass over activations.
    cast_in_wrapper = n_blocks_n >= 3
    x_in = x.astype(jnp.bfloat16) if cast_in_wrapper else x
    x_bytes = 2 if cast_in_wrapper else jnp.dtype(x.dtype).itemsize

    s = scale.reshape(1, N).astype(jnp.float32)

    # Weight streaming dominates HBM traffic: deepen its pipeline when there
    # are enough K steps to make use of a third buffer.
    w_bufs = 3 if n_steps_k >= 3 else 2
    if w_bufs == 3:
        w_spec = pl.BlockSpec((tn, tk), lambda i, j, k: (j, k),
                              pipeline_mode=pl.Buffered(3))
    else:
        w_spec = pl.BlockSpec((tn, tk), lambda i, j, k: (j, k))

    # VMEM budget, derived against v7x's 64 MiB physical VMEM: cap at ~48 MiB
    # to leave headroom for compiler scratch / DMA descriptors, no large floor.
    est = (2 * tm * tk * x_bytes          # double-buffered x
           + w_bufs * tn * tk * 1         # weight buffers (int8)
           + 2 * tn * 4                   # scale
           + 2 * tm * tn * 4              # double-buffered f32 output/accum
           + (tm * tk + tn * tk) * 2)     # bf16 cast temps
    vmem_limit = int(min(48 * 1024 * 1024, max(4 * 1024 * 1024, 2 * est)))

    return pl.pallas_call(
        _qmatmul_kernel,
        out_shape=jax.ShapeDtypeStruct((B, N), jnp.float32),
        grid_spec=pltpu.PrefetchScalarGridSpec(
            num_scalar_prefetch=0,
            grid=grid,
            in_specs=[
                pl.BlockSpec((tm, tk), lambda i, j, k: (i, k)),   # x  [B, K]
                w_spec,                                           # w  [N, K]
                pl.BlockSpec((1, tn), lambda i, j, k: (0, j)),    # scale [1, N]
            ],
            out_specs=pl.BlockSpec((tm, tn), lambda i, j, k: (i, j)),
        ),
        compiler_params=pltpu.CompilerParams(
            dimension_semantics=("parallel", "parallel", "arbitrary"),
            vmem_limit_bytes=vmem_limit,
        ),
    )(x_in, w_int, s)


# ------------------ RTN per-channel symmetric quantization -----------------
def weight_quantization_rtn(w_fp):
    """Round-to-nearest int8 symmetric quantization, per output channel (axis 0).

    Mirrors torch.ao.quantization.utils.determine_qparams with
    qscheme=per_channel_symmetric (eps=1e-5) and quantize_per_channel.
    """
    n_bits = 8
    int_min = -(2 ** (n_bits - 1))        # -128
    int_max = 2 ** (n_bits - 1) - 1       # 127
    eps = 1e-5

    min_val = jnp.min(w_fp, axis=1)
    max_val = jnp.max(w_fp, axis=1)
    min_val_neg = jnp.minimum(min_val, 0.0)
    max_val_pos = jnp.maximum(max_val, 0.0)
    # symmetric: scale = max(|min|, max) / ((qmax - qmin)/2), clamped by eps
    scale = jnp.maximum(-min_val_neg, max_val_pos) / ((int_max - int_min) / 2.0)
    scale = jnp.maximum(scale, eps)
    zero_point = jnp.zeros_like(scale, dtype=jnp.int32)

    w_int = jnp.clip(jnp.round(w_fp / scale[:, None]), int_min, int_max).astype(jnp.int8)
    return w_int, scale.astype(w_fp.dtype), zero_point


# ---------------------------------- main ------------------------------------
if __name__ == "__main__":
    key = jax.random.PRNGKey(0)
    k_x, k_w = jax.random.split(key)

    batch = 16
    input_dim = 1024
    output_dim = 512

    # Deterministic "Linear(bias=False)" weight init: U(-1/sqrt(K), 1/sqrt(K))
    bound = 1.0 / (input_dim ** 0.5)
    w_fp = jax.random.uniform(k_w, (output_dim, input_dim),
                              minval=-bound, maxval=bound, dtype=jnp.float32)
    x = jax.random.normal(k_x, (batch, input_dim), dtype=jnp.float32)

    # Quantize weights (RTN, per-channel symmetric int8) — glue, plain JAX.
    w_int, scale, _zp = weight_quantization_rtn(w_fp)

    # Pallas quantized matmul (the XlaQuantizedLinear forward).
    y = quantized_linear(x, w_int, scale)
    y = jax.block_until_ready(y)

    # Reference 1: same bf16-input / f32-accumulate numerics as the kernel.
    y_ref_bf16 = lax.dot_general(
        x.astype(jnp.bfloat16), w_int.astype(jnp.bfloat16),
        dimension_numbers=(((1,), (1,)), ((), ())),
        preferred_element_type=jnp.float32) * scale[None, :].astype(jnp.float32)

    # Reference 2: full f32 dequantized forward (looser tolerance for bf16 path).
    y_ref_f32 = (x @ w_int.astype(jnp.float32).T) * scale[None, :]

    assert y.shape == (batch, output_dim)
    assert jnp.allclose(y, y_ref_bf16, atol=1e-3, rtol=1e-3), "mismatch vs bf16 reference"
    assert jnp.allclose(y, y_ref_f32, atol=3e-2, rtol=3e-2), "mismatch vs f32 reference"

    print("KERNEL_OK")
</pallas_src>

<mosaic_0001>
module attributes {stable_mosaic.version = 11 : i64} {
  func.func @_qmatmul_kernel(%arg0: i32, %arg1: i32, %arg2: i32, %arg3: memref<16x512xf32, #tpu.memory_space<vmem>>, %arg4: memref<256x512xi8, #tpu.memory_space<vmem>>, %arg5: memref<1x256xf32, #tpu.memory_space<vmem>>, %arg6: memref<16x256xf32, #tpu.memory_space<vmem>>) attributes {dimension_semantics = [#tpu.dimension_semantics<parallel>, #tpu.dimension_semantics<parallel>, #tpu.dimension_semantics<arbitrary>], iteration_bounds = array<i64: 1, 2, 2>, scalar_prefetch = 0 : i64, scratch_operands = 0 : i64, tpu.core_type = #tpu.core_type<tc>, window_params = [{transform_indices = @transform_0, window_bounds = array<i64: 16, 512>}, {transform_indices = @transform_1, window_bounds = array<i64: 256, 512>}, {transform_indices = @transform_2, window_bounds = array<i64: 1, 256>}, {transform_indices = @transform_3, window_bounds = array<i64: 16, 256>}]} {
    %c0_i32 = arith.constant 0 : i32
    %0 = arith.cmpi eq, %arg2, %c0_i32 : i32
    %1 = arith.extui %0 : i1 to i32
    %c0_i32_0 = arith.constant 0 : i32
    %2 = arith.cmpi ne, %1, %c0_i32_0 : i32
    scf.if %2 {
      %cst_9 = arith.constant 0.000000e+00 : f32
      %14 = vector.broadcast %cst_9 : f32 to vector<16x256xf32>
      %c0_10 = arith.constant 0 : index
      %c0_11 = arith.constant 0 : index
      %15 = vector.load %arg6[%c0_10, %c0_11] : memref<16x256xf32, #tpu.memory_space<vmem>>, vector<16x256xf32>
      tpu.vector_store %arg6[%c0_10, %c0_11], %14 {strides = array<i32>} : memref<16x256xf32, #tpu.memory_space<vmem>>, vector<16x256xf32>,
    } else {
    }
    %c0 = arith.constant 0 : index
    %c0_1 = arith.constant 0 : index
    %3 = vector.load %arg3[%c0, %c0_1] : memref<16x512xf32, #tpu.memory_space<vmem>>, vector<16x512xf32>
    %4 = arith.truncf %3 : vector<16x512xf32> to vector<16x512xbf16>
    %c0_2 = arith.constant 0 : index
    %c0_3 = arith.constant 0 : index
    %5 = vector.load %arg4[%c0_2, %c0_3] : memref<256x512xi8, #tpu.memory_space<vmem>>, vector<256x512xi8>
    %6 = arith.sitofp %5 : vector<256x512xi8> to vector<256x512xbf16>
    %c0_4 = arith.constant 0 : index
    %c0_5 = arith.constant 0 : index
    %7 = vector.load %arg6[%c0_4, %c0_5] : memref<16x256xf32, #tpu.memory_space<vmem>>, vector<16x256xf32>
    %cst = arith.constant dense<0.000000e+00> : vector<16x256xf32>
    %8 = tpu.matmul %4, %6, %cst {dimension_numbers = #tpu.dot_dimension_numbers<[1], [1], [0], [0], [0, 0, 1, 0], [], []>} : vector<16x512xbf16>, vector<256x512xbf16>, vector<16x256xf32> -> vector<16x256xf32>
    %9 = arith.addf %7, %8 : vector<16x256xf32>
    %c0_6 = arith.constant 0 : index
    %c0_7 = arith.constant 0 : index
    %10 = vector.load %arg6[%c0_6, %c0_7] : memref<16x256xf32, #tpu.memory_space<vmem>>, vector<16x256xf32>
    tpu.vector_store %arg6[%c0_6, %c0_7], %9 {strides = array<i32>} : memref<16x256xf32, #tpu.memory_space<vmem>>, vector<16x256xf32>,
    %c1_i32 = arith.constant 1 : i32
    %11 = arith.cmpi eq, %arg2, %c1_i32 : i32
    %12 = arith.extui %11 : i1 to i32
    %c0_i32_8 = arith.constant 0 : i32
    %13 = arith.cmpi ne, %12, %c0_i32_8 : i32
    scf.if %13 {
      %c0_9 = arith.constant 0 : index
      %c0_10 = arith.constant 0 : index
      %14 = vector.load %arg6[%c0_9, %c0_10] : memref<16x256xf32, #tpu.memory_space<vmem>>, vector<16x256xf32>
      %c0_11 = arith.constant 0 : index
      %c0_12 = arith.constant 0 : index
      %15 = vector.load %arg5[%c0_11, %c0_12] : memref<1x256xf32, #tpu.memory_space<vmem>>, vector<1x256xf32>
      %16 = vector.broadcast %15 : vector<1x256xf32> to vector<16x256xf32>
      %17 = arith.mulf %14, %16 : vector<16x256xf32>
      %c0_13 = arith.constant 0 : index
      %c0_14 = arith.constant 0 : index
      %18 = vector.load %arg6[%c0_13, %c0_14] : memref<16x256xf32, #tpu.memory_space<vmem>>, vector<16x256xf32>
      tpu.vector_store %arg6[%c0_13, %c0_14], %17 {strides = array<i32>} : memref<16x256xf32, #tpu.memory_space<vmem>>, vector<16x256xf32>,
    } else {
    }
    return
  }
  func.func @transform_0(%arg0: i32, %arg1: i32, %arg2: i32) -> (i32, i32) {
    %c0_i32 = arith.constant 0 : i32
    return %arg0, %arg2 : i32, i32
  }
  func.func @transform_1(%arg0: i32, %arg1: i32, %arg2: i32) -> (i32, i32) {
    %c0_i32 = arith.constant 0 : i32
    return %arg1, %arg2 : i32, i32
  }
  func.func @transform_2(%arg0: i32, %arg1: i32, %arg2: i32) -> (i32, i32) {
    %c0_i32 = arith.constant 0 : i32
    %c0_i32_0 = arith.constant 0 : i32
    return %c0_i32, %arg1 : i32, i32
  }
  func.func @transform_3(%arg0: i32, %arg1: i32, %arg2: i32) -> (i32, i32) {
    %c0_i32 = arith.constant 0 : i32
    return %arg0, %arg1 : i32, i32
  }
}

</mosaic_0001>

<bundles_post_ra>
// kernel: tpu_custom_call.1
= control target key start
LH: loop header
LB: loop body
LE: loop exit
PB: predicated region body
PF: predicated region fallthrough
CT: control target
= control target key end

     0   :  { %s1528_s0 = inlined_call_operand.hbm [shape: f32[16,1024], index: 0, kind: input, shape index: {}]   ;;  %s1529_s1 = inlined_call_operand.hbm [shape: s8[512,1024], index: 1, kind: input, shape index: {}]   ;;  %s1530_s2 = inlined_call_operand.vmem [shape: f32[1,512], index: 2, kind: input, shape index: {}]   ;;  %s1531_s3 = inlined_call_operand.hbm [shape: f32[16,512], index: 3, kind: output, shape index: {}]  }
   0x1   :  { %1545 = sst [smem:[#allocation17_spill]] %s1528_s0 }
   0x2   :  { %1546 = sst [smem:[#allocation18_spill]] %s1531_s3 }
   0x3   :  { %8 = vsyncpa [#allocation3], 0 }
   0x4   :  { %10 = vsyncpa [#allocation3 + $0x1], 0 }
   0x5   :  { %11 = vsyncpa [#allocation6], 0 }
   0x6   :  { %13 = vsyncpa [#allocation6 + $0x1], 0 }
   0x7   :  { %14 = vsyncpa [#allocation4], 0 }
   0x8   :  { %16 = vsyncpa [#allocation4 + $0x1], 0  ;;  %s1083_s12 = smov 0   ;;  %s1085_s13 = smov 0  }
   0x9   :  { %s1087_s14 = smov 0   ;;  %s1089_s15 = smov 0  }
   0xa   :  { %s1091_s16 = smov 0   ;;  %s1093_s17 = smov 0  }
   0xb   :  { %s1095_s18 = smov 0   ;;  %s1097_s19 = smov 0  }
   0xc   :  { %s1099_s20 = smov 0   ;;  %s1101_s21 = smov 0  }
   0xd   :  { %s1103_s22 = smov 0   ;;  %s1105_s23 = smov 0  }
   0xe   :  { %s1107_s24 = smov 0   ;;  %s1109_s25 = smov 0  }
   0xf LB: > { %1547 = sst [smem:[#allocation11_spill]] %s1031_s20  ;;  %s672_s26 = sadd.s32 4294967295, %s1051_s25   ;;  %s1051_s25 = sphi %s1109_s25, %s22_s25   ;;  %s1047_s24 = sphi %s1107_s24, %s1597_s24   ;;  %s1043_s23 = sphi %s1105_s23, %s1596_s23   ;;  %s1039_s22 = sphi %s1103_s22, %s1595_s22   ;;  %s1035_s21 = sphi %s1101_s21, %s1594_s21   ;;  %s1031_s20 = sphi %s1099_s20, %s1583_s20   ;;  %s1027_s19 = sphi %s1097_s19, %s1593_s19   ;;  %s1023_s18 = sphi %s1095_s18, %s1592_s18   ;;  %s1019_s17 = sphi %s1093_s17, %s1591_s17   ;;  %s1015_s16 = sphi %s1091_s16, %s1590_s16   ;;  %s1011_s15 = sphi %s1089_s15, %s1589_s15   ;;  %s1007_s14 = sphi %s1087_s14, %s1588_s14   ;;  %s1003_s13 = sphi %s1085_s13, %s1587_s13   ;;  %s999_s12 = sphi %s1083_s12, %s1586_s12  }
  0x10   : > { %1548 = sst [smem:[#allocation12_spill]] %s1035_s21  ;;  %s34_s27 = sadd.s32 1, %s1043_s23 }
  0x11   : > { %p1153_p0 = scmp.ge.s32.totalorder %s34_s27, 2  ;;  %s50_s29 = sadd.s32 1, %s1031_s20 }
  0x12   : > { %p57_p1 = scmp.ne.s32.totalorder %s1031_s20, %s1027_s19  ;;  %p1535_p2 = scmp.eq.s32.totalorder %s1051_s25, 0 }
  0x13   : > { %s1599_s27 = smov (%p1153_p0, %s34_s27), 0  ;;  %p63_p4 = scmp.ne.s32.totalorder %s1027_s19, %s1023_s18 }
  0x14   : > { %1550 = sst [smem:[#allocation13_spill]] %s1599_s27  ;;  %p1167_p3 = por %p1535_p2, %p57_p1 }
  0x15   : > { %s1174_s4 = ssub.s32 %s1043_s23, %s1599_s27  ;;  %p1176_p5 = scmp.eq.s32.totalorder %s672_s26, 0 }
  0x16   : > { %p48_p6 = scmp.eq.s32.totalorder %s1174_s4, 0  ;;  %p1181_p7 = scmp.eq.s32.totalorder %s672_s26, 3 }
  0x17   : > { %s1552_s5 = scalar_select %p1176_p5, 1, 0 }
  0x18   : > { %s1553_s6 = scalar_select %p1181_p7, 1, 0 }
  0x19   : > { %p1187_p8 = por %p1176_p5, %p63_p4  ;;  %p1534_p9 = scmp.lt.s32.totalorder %s1051_s25, 4 }
  0x1a   : > { %s1192_s8 = scalar_select %p48_p6, %s1031_s20, %s50_s29  }
  0x1b   : > { %s1554_s7 = scalar_select %p1187_p8, 1, 0 }
  0x1c   : > { %1555 = sst [smem:[#allocation14_spill]] %s1192_s8  ;;  %s169_s9 = sand.u32 1, %s1031_s20  }
  0x1d   : > { %s676_s10 = sshll.u32 %s169_s9, 6  ;;  %s696_s11 = sshll.u32 %s1043_s23, 9 }
  0x1e   : > { %s1556_s0 = sld [smem:[#allocation17_spill]]  ;;  %s173_s26 = scalar_lea.vmem [#allocation2], %s676_s10 }
  0x1f   : > { %s183_s21 = sshll.u32 %s173_s26, 4  ;;  %p1208_p10 = pnand %p1534_p9, %p1167_p3  ;;  %s1202_s21 = int_to_ptr.vmem [resolvable:$true] %s183_s21 }
  0x20   : > { %s1212_s8 = scalar_lea.sflag [#allocation3], %s169_s9 }
  0x21   : > { %p843_p12 = pneg %p1208_p10 }
  0x24   : > { %s1200_s3 = scalar_lea.hbm %s1556_s0, %s696_s11  ;;  %s846_s30 = scalar_lea.hbm %s1556_s0, 2048 }
  0x25   : > { %s841_s27 = scalar_lea.hbm %s1200_s3, 1024  ;;  %p847_p3 = scmp.lt.u32.totalorder %s1200_s3, %s1556_s0 }
  0x26   : > { %p842_p11 = scmp.ne.s32.totalorder %s1200_s3, %s841_s27  ;;  %p848_p4 = scmp.lt.u32.totalorder %s846_s30, %s841_s27 }
  0x27   : > { %p850_p9 = scmp.lt.u32.totalorder %s841_s27, %s1200_s3 }
  0x28   : > { %p844_p13 = pnand %p843_p12, %p842_p11  ;;  %p849_p6 = por %p848_p4, %p847_p3 }
  0x2a   : > { %p845_p1 = pneg %p844_p13  ;;  %p851_p2 = por %p850_p9, %p849_p6 }
  0x2c   : > { %p852_p8 = pnand %p851_p2, %p845_p1 }
  0x2e   : > { %855 = shalt.err (!%p852_p8)
}
  0x2f   : > { %s856_s9 = scalar_lea.vmem %s1202_s21, 1024  ;;  %s1053_s10 = smov [#allocation2]  }
  0x30   : > { %p857_p11 = scmp.ne.s32.totalorder %s1202_s21, %s856_s9  ;;  %s861_s11 = sshll.u32 %s1053_s10, 4  ;;  %s862_s11 = int_to_ptr.vmem [resolvable:$false] %s861_s11 }
  0x31   : > { %s863_s18 = scalar_lea.vmem %s862_s11, 2048  ;;  %p864_p5 = scmp.lt.s32.totalorder %s1202_s21, %s862_s11 }
  0x32   : > { %p859_p13 = pnand %p857_p11, %p843_p12  ;;  %p865_p3 = scmp.lt.s32.totalorder %s863_s18, %s856_s9 }
  0x34   : > { %p860_p7 = pneg %p859_p13  ;;  %p866_p4 = por %p865_p3, %p864_p5 }
  0x36   : > { %p867_p9 = pnand %p866_p4, %p860_p7 }
  0x38   : > { %870 = shalt.err (!%p867_p9)
}
  0x39   : > { %s1538_s27 = smov 1024   ;;  %s1539_s30 = smov 512  }
  0x3a   : > { %s1540_s26 = smov 32   ;;  %p684_p2 = scmp.ge.s32.totalorder %s1051_s25, 1 }
  0x3b   : > { %712 = dma.hbm_to_vmem [thread:$0]  (!%p1208_p10), %s1200_s3, 1024, %s1202_s21, %s1212_s8, %s1538_s27, %s1539_s30, %s1540_s26  }
  0x3c   : > { %p223_p5 = scmp.lt.s32.totalorder %s1051_s25, 5  ;;  %s673_s10 = sadd.s32 4294967294, %s1051_s25  }
  0x3d   : > { %s37_s11 = sadd.s32 1, %s1047_s24  ;;  %s78_s18 = sadd.s32 1, %s1019_s17 }
  0x3e   : > { %p1245_p7 = pnand %p684_p2, %p223_p5  ;;  %s1601_s11 = smov (!%p1153_p0, %s37_s11), %s1047_s24 }
  0x3f   : > { %p85_p8 = scmp.ne.s32.totalorder %s1019_s17, %s1015_s16  ;;  %p91_p10 = scmp.ne.s32.totalorder %s1015_s16, %s1011_s15 }
  0x40   : > { %p39_p12 = scmp.ge.s32.totalorder %s1601_s11, 2  ;;  %s132_s3 = sadd.s32 1, %s1007_s14 }
  0x41   : > { %p1559_p1 = scmp.eq.s32.totalorder %s1051_s25, 0  ;;  %p1561_p11 = scmp.ne.s32.totalorder %s1552_s5, 0 }
  0x42   : > { %s1603_s11 = smov (%p39_p12, %s1601_s11), 0  ;;  %p142_p0 = scmp.ne.s32.totalorder %s1007_s14, %s1003_s13 }
  0x43   : > { %p1262_p6 = por %p85_p8, %p1559_p1  ;;  %p1268_p13 = por %p91_p10, %p1561_p11 }
  0x44   : > { %1563 = sst [smem:[#allocation15_spill]] %s1603_s11  ;;  %p148_p3 = scmp.ne.s32.totalorder %s1003_s13, %s999_s12 }
  0x45   : > { %s1562_s8 = scalar_select %p1268_p13, 1, 0 }
  0x46   : > { %s73_s15 = ssub.s32 %s1047_s24, %s1603_s11  ;;  %p149_p4 = scmp.eq.s32.totalorder %s673_s10, 3 }
  0x47   : > { %s75_s28 = sor.u32 %s73_s15, %s1174_s4  ;;  %p130_p9 = scmp.eq.s32.totalorder %s73_s15, 0 }
  0x48   : > { %p76_p2 = scmp.eq.s32.totalorder %s75_s28, 0  ;;  %p1564_p5 = scmp.ne.s32.totalorder %s1553_s6, 0 }
  0x49   : > { %s1288_s29 = scalar_select %p130_p9, %s1007_s14, %s132_s3  }
  0x4a   : > { %p1283_p8 = por %p1564_p5, %p142_p0  ;;  %p1293_p10 = por %p149_p4, %p148_p3 }
  0x4b   : > { %s1291_s27 = scalar_select %p76_p2, %s1019_s17, %s78_s18  }
  0x4c   : > { %s1565_s5 = scalar_select %p1283_p8, 1, 0 }
  0x4d   : > { %1566 = sst [smem:[#allocation16_spill]] %s1291_s27  ;;  %s193_s26 = sand.u32 1, %s1019_s17  }
  0x4e   : > { %s1567_s30 = scalar_select %p1293_p10, 1, 0 }
  0x4f   : > { %s679_s10 = sshll.u32 %s193_s26, 8  ;;  %s681_s4 = sshll.u32 %s1043_s23, 2 }
  0x50   : > { %s697_s0 = sshll.u32 %s1047_s24, 6  ;;  %s197_s11 = scalar_lea.vmem [#allocation5], %s679_s10 }
  0x51   : > { %s207_s15 = sshll.u32 %s197_s11, 4  ;;  %s204_s28 = sadd.s32 %s697_s0, %s681_s4  ;;  %s1300_s15 = int_to_ptr.vmem [resolvable:$true] %s207_s15 }
  0x52   : > { %s683_s6 = sshll.u32 %s204_s28, 7  ;;  %p1568_p12 = scmp.lt.s32.totalorder %s1051_s25, 4 }
  0x53   : > { %s1313_s27 = scalar_lea.hbm %s1529_s1, %s683_s6  ;;  %s1315_s0 = scalar_lea.sflag [#allocation6], %s193_s26 }
  0x54   : > { %p1306_p1 = pnand %p1568_p12, %p1262_p6  ;;  %s871_s11 = scalar_lea.hbm %s1313_s27, 4096 }
  0x55   : > { %p872_p11 = scmp.ne.s32.totalorder %s1313_s27, %s871_s11  ;;  %s876_s10 = scalar_lea.hbm %s1529_s1, 16384 }
  0x56   : > { %p873_p6 = pneg %p1306_p1  ;;  %p877_p4 = scmp.lt.u32.totalorder %s1313_s27, %s1529_s1 }
  0x57   : > { %p878_p9 = scmp.lt.u32.totalorder %s876_s10, %s871_s11  ;;  %p880_p5 = scmp.lt.u32.totalorder %s871_s11, %s1313_s27 }
  0x58   : > { %p874_p0 = pnand %p873_p6, %p872_p11 }
  0x59   : > { %p879_p2 = por %p878_p9, %p877_p4 }
  0x5a   : > { %p875_p3 = pneg %p874_p0 }
  0x5b   : > { %p881_p12 = por %p880_p5, %p879_p2 }
  0x5d   : > { %p882_p10 = pnand %p881_p12, %p875_p3 }
  0x5f   : > { %885 = shalt.err (!%p882_p10)
}
  0x60   : > { %s886_s26 = scalar_lea.vmem %s1300_s15, 4096  ;;  %s1057_s6 = smov [#allocation5]  }
  0x61   : > { %p887_p11 = scmp.ne.s32.totalorder %s1300_s15, %s886_s26  ;;  %s891_s18 = sshll.u32 %s1057_s6, 4  ;;  %s892_s18 = int_to_ptr.vmem [resolvable:$false] %s891_s18 }
  0x62   : > { %s893_s21 = scalar_lea.vmem %s892_s18, 8192  ;;  %p894_p13 = scmp.lt.s32.totalorder %s1300_s15, %s892_s18 }
  0x63   : > { %p889_p0 = pnand %p887_p11, %p873_p6  ;;  %p895_p4 = scmp.lt.s32.totalorder %s893_s21, %s886_s26 }
  0x65   : > { %p890_p8 = pneg %p889_p0  ;;  %p896_p9 = por %p895_p4, %p894_p13 }
  0x67   : > { %p897_p2 = pnand %p896_p9, %p890_p8 }
  0x69   : > { %900 = shalt.err (!%p897_p2)
}
  0x6a   : > { %s1570_s11 = smov 32   ;;  %s1571_s20 = smov 512  }
  0x6b   : > { %s1572_s10 = smov 1024   ;;  %227 = sbr.rel (%p1245_p7) target bundleno = 525 (0x20d), region = 32 }
  0x6c   : > { %715 = dma.hbm_to_vmem [thread:$0]  (!%p1306_p1), %s1313_s27, 4096, %s1300_s15, %s1315_s0, %s1572_s10, %s1571_s20, %s1570_s11  }
  0x6d   : > { %s229_s4 = sand.u32 (!%p1245_p7), 1, %s1027_s19   ;;  %p1573_p13 = scmp.ne.s32.totalorder (!%p1245_p7), %s1554_s7, 0 }
  0x6e   : > { %s685_s28 = sshll.u32 (!%p1245_p7), %s229_s4, 6  ;;  %s230_s26 = scalar_lea.sflag (!%p1245_p7), [#allocation3], %s229_s4 }
  0x6f   : > { %s1349_s6 = scalar_lea.vmem (!%p1245_p7), [#allocation2], %s685_s28 }
  0x72   : > { %986 = dma.done.wait (%p1573_p13), %s230_s26, 1024  }
  0x73   : > { %988 = vsyncadd (%p1573_p13), %s230_s26, 4294966272  ;;  %s238_s3 = sand.u32 1, %s1015_s16   ;;  %p1574_p7 = scmp.ne.s32.totalorder %s1562_s8, 0 }
  0x74   : > { %s686_s18 = sshll.u32 %s238_s3, 8  ;;  %s239_s27 = scalar_lea.sflag [#allocation6], %s238_s3 }
  0x75   : > { %s1356_s15 = scalar_lea.vmem [#allocation5], %s686_s18 }
  0x76   : > { %990 = dma.done.wait (%p1574_p7), %s239_s27, 4096  }
  0x77   : > { %992 = vsyncadd (%p1574_p7), %s239_s27, 4294963200  ;;  %s271_s9 = sand.u32 1, %s1003_s13   ;;  %s688_s0 = sshll.u32 %s1039_s22, 1 }
  0x78   : > { %s687_s7 = sshll.u32 %s271_s9, 5  ;;  %p279_p8 = scmp.lt.s32.totalorder %s688_s0, 3 }
  0x79   : > { %s1372_s10 = scalar_lea.vmem [#allocation7], %s687_s7  ;;  %s1575_s4 = sld [smem:[#allocation12_spill]] }
  0x7a   : > { %s1605_s0 = smov (!%p279_p8, %s688_s0), 3 }
  0x7b   : > { %s281_s20 = scalar_lea.vmem %s1530_s2, %s1605_s0 }
  0x7f   : > { %p689_p10 = scmp.ne.s32.totalorder %s1575_s4, 0 }
  0x80   : > { %v1058_v0 = vmov (!%p689_p10), 0.0  }
  0x81   : > { %288 = sbr.rel (%p689_p10) target bundleno = 136 (0x88), region = 44  ;;  %289 = vst [vmem:[%s1372_s10] sm:$0xff] (!%p689_p10), %v1058_v0  ;;  %290 = vst [vmem:[%s1372_s10 + $0x8] sm:$0xff] (!%p689_p10), %v1058_v0 }
  0x82   : > { %291 = vst [vmem:[%s1372_s10 + $0x10] sm:$0xff] (!%p689_p10), %v1058_v0  ;;  %292 = vst [vmem:[%s1372_s10 + $0x18] sm:$0xff] (!%p689_p10), %v1058_v0 }
  0x88 PF: > { %v306_v1 = vld [vmem:[%s1356_s15 + $0x8] sm:$0xff]  ;;  %v308_v2 = vld [vmem:[%s1356_s15 + $0x18] sm:$0xff]  ;;  %v305_v3 = vld [vmem:[%s1356_s15] sm:$0xff]  ;;  %s1576_s8 = sld [smem:[#allocation12_spill]] }
  0x89   : > { %v338_v4 = vunpack.c.l.s8.bf16 %v306_v1  ;;  %v342_v5 = vunpack.c.h.s8.bf16 %v306_v1  ;;  %v340_v6 = vunpack.c.l.s8.bf16 %v308_v2  ;;  %v344_v7 = vunpack.c.h.s8.bf16 %v308_v2  ;;  %v307_v8 = vld [vmem:[%s1356_s15 + $0x10] sm:$0xff]  ;;  %v310_v11 = vld [vmem:[%s1356_s15 + $0x28] sm:$0xff]  ;;  %v312_v12 = vld [vmem:[%s1356_s15 + $0x38] sm:$0xff] }
  0x8a   : > { %v337_v9 = vunpack.c.l.s8.bf16 %v305_v3  ;;  %v339_v10 = vunpack.c.l.s8.bf16 %v307_v8  ;;  %v341_v13 = vunpack.c.h.s8.bf16 %v305_v3  ;;  %v343_v14 = vunpack.c.h.s8.bf16 %v307_v8  ;;  %v309_v17 = vld [vmem:[%s1356_s15 + $0x20] sm:$0xff]  ;;  %v311_v18 = vld [vmem:[%s1356_s15 + $0x30] sm:$0xff]  ;;  %v294_v19 = vld [vmem:[%s1349_s6 + $0x8] sm:$0xff] }
  0x8b   : > { %405 = vmatprep.subr.bf16.mxu1 %v338_v4  ;;  %448 = vmatprep.subr.bf16.mxu0 %v340_v6  ;;  %v346_v15 = vunpack.c.l.s8.bf16 %v310_v11  ;;  %v348_v16 = vunpack.c.l.s8.bf16 %v312_v12  ;;  %v298_v20 = vld [vmem:[%s1349_s6 + $0x28] sm:$0xff]  ;;  %v296_v21 = vld [vmem:[%s1349_s6 + $0x18] sm:$0xff]  ;;  %v345_v23 = vunpack.c.l.s8.bf16 %v309_v17  ;;  %v347_v24 = vunpack.c.l.s8.bf16 %v311_v18  ;;  %v313_v35 = vld [vmem:[%s1356_s15 + $0x40] sm:$0xff] }
  0x8c   : > { %406 = vmatpush1.bf16.xpose.msra.mxu1 %v337_v9  ;;  %449 = vmatpush1.bf16.xpose.msra.mxu0 %v339_v10  ;;  %v300_v22 = vld [vmem:[%s1349_s6 + $0x38] sm:$0xff]  ;;  %v350_v25 = vunpack.c.h.s8.bf16 %v310_v11  ;;  %v352_v26 = vunpack.c.h.s8.bf16 %v312_v12  ;;  %v302_v27 = vpack.c.bf16 %v298_v20, %v294_v19  ;;  %v314_v29 = vld [vmem:[%s1356_s15 + $0x48] sm:$0xff]  ;;  %v349_v31 = vunpack.c.h.s8.bf16 %v309_v17  ;;  %v315_v36 = vld [vmem:[%s1356_s15 + $0x50] sm:$0xff] }
  0x8d   : > { %407 = vmatprep.subr.bf16.mxu1 %v342_v5  ;;  %450 = vmatprep.subr.bf16.mxu0 %v344_v7  ;;  %v304_v28 = vpack.c.bf16 %v300_v22, %v296_v21  ;;  %v316_v30 = vld [vmem:[%s1356_s15 + $0x58] sm:$0xff]  ;;  %v351_v32 = vunpack.c.h.s8.bf16 %v311_v18  ;;  %v354_v33 = vunpack.c.l.s8.bf16 %v314_v29  ;;  %v353_v37 = vunpack.c.l.s8.bf16 %v313_v35  ;;  %v318_v41 = vld [vmem:[%s1356_s15 + $0x68] sm:$0xff]  ;;  %v317_v47 = vld [vmem:[%s1356_s15 + $0x60] sm:$0xff] }
  0x8e   : > { %437 = vmatprep.mubr.bf16.mxu1 %v302_v27  ;;  %v356_v34 = vunpack.c.l.s8.bf16 %v316_v30  ;;  %v355_v38 = vunpack.c.l.s8.bf16 %v315_v36  ;;  %v358_v39 = vunpack.c.h.s8.bf16 %v314_v29  ;;  %v360_v40 = vunpack.c.h.s8.bf16 %v316_v30  ;;  %v320_v42 = vld [vmem:[%s1356_s15 + $0x78] sm:$0xff]  ;;  %v319_v48 = vld [vmem:[%s1356_s15 + $0x70] sm:$0xff]  ;;  %v322_v53 = vld [vmem:[%s1356_s15 + $0x88] sm:$0xff]  ;;  %p690_p1 = scmp.ne.s32.totalorder %s1576_s8, 1 }
  0x8f   : > { %480 = vmatprep.mubr.bf16.mxu0 %v304_v28  ;;  %v357_v43 = vunpack.c.h.s8.bf16 %v313_v35  ;;  %v359_v44 = vunpack.c.h.s8.bf16 %v315_v36  ;;  %v362_v45 = vunpack.c.l.s8.bf16 %v318_v41  ;;  %v364_v46 = vunpack.c.l.s8.bf16 %v320_v42  ;;  %v324_v54 = vld [vmem:[%s1356_s15 + $0x98] sm:$0xff]  ;;  %v321_v59 = vld [vmem:[%s1356_s15 + $0x80] sm:$0xff]  ;;  %v323_v60 = vld [vmem:[%s1356_s15 + $0x90] sm:$0xff] }
  0x90   : > { %v361_v49 = vunpack.c.l.s8.bf16 %v317_v47  ;;  %v363_v50 = vunpack.c.l.s8.bf16 %v319_v48  ;;  %v366_v51 = vunpack.c.h.s8.bf16 %v318_v41  ;;  %v368_v52 = vunpack.c.h.s8.bf16 %v320_v42  ;;  %v326_v1 = vld [vmem:[%s1356_s15 + $0xa8] sm:$0xff]  ;;  %v328_v2 = vld [vmem:[%s1356_s15 + $0xb8] sm:$0xff]  ;;  %v325_v7 = vld [vmem:[%s1356_s15 + $0xa0] sm:$0xff] }
  0x91   : > { %v365_v55 = vunpack.c.h.s8.bf16 %v317_v47  ;;  %v367_v56 = vunpack.c.h.s8.bf16 %v319_v48  ;;  %v370_v57 = vunpack.c.l.s8.bf16 %v322_v53  ;;  %v372_v58 = vunpack.c.l.s8.bf16 %v324_v54  ;;  %v327_v8 = vld [vmem:[%s1356_s15 + $0xb0] sm:$0xff]  ;;  %v329_v19 = vld [vmem:[%s1356_s15 + $0xc0] sm:$0xff] }
  0x92   : > { %v369_v61 = vunpack.c.l.s8.bf16 %v321_v59  ;;  %v371_v62 = vunpack.c.l.s8.bf16 %v323_v60  ;;  %v374_v63 = vunpack.c.h.s8.bf16 %v322_v53  ;;  %v376_v0 = vunpack.c.h.s8.bf16 %v324_v54  ;;  %v331_v20 = vld [vmem:[%s1356_s15 + $0xd0] sm:$0xff] }
  0x93   : > { %v373_v3 = vunpack.c.h.s8.bf16 %v321_v59  ;;  %v375_v4 = vunpack.c.h.s8.bf16 %v323_v60  ;;  %v378_v5 = vunpack.c.l.s8.bf16 %v326_v1  ;;  %v380_v6 = vunpack.c.l.s8.bf16 %v328_v2  ;;  %v295_v41 = vld [vmem:[%s1349_s6 + $0x10] sm:$0xff]  ;;  %v404_v59 = vld [vmem:[%s1372_s10 + $0x18] sm:$0xff] }
  0x94   : > { %408 = vmatpush1.bf16.xpose.msra.mxu1 %v341_v13  ;;  %451 = vmatpush1.bf16.xpose.msra.mxu0 %v343_v14  ;;  %v377_v9 = vunpack.c.l.s8.bf16 %v325_v7  ;;  %v379_v10 = vunpack.c.l.s8.bf16 %v327_v8  ;;  %v382_v11 = vunpack.c.h.s8.bf16 %v326_v1  ;;  %v384_v12 = vunpack.c.h.s8.bf16 %v328_v2  ;;  %v330_v13 = vld [vmem:[%s1356_s15 + $0xc8] sm:$0xff]  ;;  %v332_v14 = vld [vmem:[%s1356_s15 + $0xd8] sm:$0xff]  ;;  %v299_v42 = vld [vmem:[%s1349_s6 + $0x30] sm:$0xff] }
  0x95   : > { %409 = vmatprep.subr.bf16.mxu1 %v346_v15  ;;  %452 = vmatprep.subr.bf16.mxu0 %v348_v16  ;;  %v381_v15 = vunpack.c.h.s8.bf16 %v325_v7  ;;  %v383_v16 = vunpack.c.h.s8.bf16 %v327_v8  ;;  %v386_v17 = vunpack.c.l.s8.bf16 %v330_v13  ;;  %v388_v18 = vunpack.c.l.s8.bf16 %v332_v14  ;;  %v403_v54 = vld [vmem:[%s1372_s10 + $0x10] sm:$0xff] }
  0x96   : > { %v385_v21 = vunpack.c.l.s8.bf16 %v329_v19  ;;  %v387_v22 = vunpack.c.l.s8.bf16 %v331_v20  ;;  %v389_v27 = vunpack.c.h.s8.bf16 %v329_v19  ;;  %v391_v28 = vunpack.c.h.s8.bf16 %v331_v20 }
  0x97   : > { %v509_v1 = vlaneseq (!%p690_p1) }
  0x99   : > { %v510_v2 = vshrl.u32 (!%p690_p1), %v509_v1, 7 }
  0x9c   : > { %410 = vmatpush1.bf16.xpose.msra.mxu1 %v345_v23  ;;  %453 = vmatpush1.bf16.xpose.msra.mxu0 %v347_v24  ;;  %v390_v23 = vunpack.c.h.s8.bf16 %v330_v13  ;;  %v392_v24 = vunpack.c.h.s8.bf16 %v332_v14 }
  0x9d   : > { %411 = vmatprep.subr.bf16.mxu1 %v350_v25  ;;  %454 = vmatprep.subr.bf16.mxu0 %v352_v26  ;;  %v334_v25 = vld [vmem:[%s1356_s15 + $0xe8] sm:$0xff]  ;;  %v336_v26 = vld [vmem:[%s1356_s15 + $0xf8] sm:$0xff] }
  0x9e   : > { %v394_v29 = vunpack.c.l.s8.bf16 %v334_v25  ;;  %v396_v30 = vunpack.c.l.s8.bf16 %v336_v26  ;;  %v398_v35 = vunpack.c.h.s8.bf16 %v334_v25  ;;  %v400_v36 = vunpack.c.h.s8.bf16 %v336_v26 }
  0xa4   : > { %412 = vmatpush1.bf16.xpose.msra.mxu1 %v349_v31  ;;  %455 = vmatpush1.bf16.xpose.msra.mxu0 %v351_v32  ;;  %v333_v31 = vld [vmem:[%s1356_s15 + $0xe0] sm:$0xff]  ;;  %v335_v32 = vld [vmem:[%s1356_s15 + $0xf0] sm:$0xff] }
  0xa5   : > { %413 = vmatprep.subr.bf16.mxu1 %v354_v33  ;;  %456 = vmatprep.subr.bf16.mxu0 %v356_v34  ;;  %v393_v33 = vunpack.c.l.s8.bf16 %v333_v31  ;;  %v395_v34 = vunpack.c.l.s8.bf16 %v335_v32 }
  0xac   : > { %414 = vmatpush1.bf16.xpose.msra.mxu1 %v353_v37  ;;  %457 = vmatpush1.bf16.xpose.msra.mxu0 %v355_v38  ;;  %v397_v37 = vunpack.c.h.s8.bf16 %v333_v31  ;;  %v399_v38 = vunpack.c.h.s8.bf16 %v335_v32 }
  0xad   : > { %415 = vmatprep.subr.bf16.mxu1 %v358_v39  ;;  %458 = vmatprep.subr.bf16.mxu0 %v360_v40  ;;  %v293_v39 = vld [vmem:[%s1349_s6] sm:$0xff] }
  0xae   : > { %v297_v40 = vld [vmem:[%s1349_s6 + $0x20] sm:$0xff] }
  0xb4   : > { %416 = vmatpush1.bf16.xpose.msra.mxu1 %v357_v43  ;;  %459 = vmatpush1.bf16.xpose.msra.mxu0 %v359_v44  ;;  %v301_v43 = vpack.c.bf16 %v297_v40, %v293_v39  ;;  %v303_v44 = vpack.c.bf16 %v299_v42, %v295_v41 }
  0xb5   : > { %417 = vmatprep.subr.bf16.mxu1 %v362_v45  ;;  %460 = vmatprep.subr.bf16.mxu0 %v364_v46  ;;  %v401_v46 = vld [vmem:[%s1372_s10] sm:$0xff] }
  0xbc   : > { %418 = vmatpush1.bf16.xpose.msra.mxu1 %v361_v49  ;;  %461 = vmatpush1.bf16.xpose.msra.mxu0 %v363_v50  ;;  %v402_v50 = vld [vmem:[%s1372_s10 + $0x8] sm:$0xff] }
  0xbd   : > { %419 = vmatprep.subr.bf16.mxu1 %v366_v51  ;;  %462 = vmatprep.subr.bf16.mxu0 %v368_v52 }
  0xc4   : > { %420 = vmatpush1.bf16.xpose.msra.mxu1 %v365_v55  ;;  %463 = vmatpush1.bf16.xpose.msra.mxu0 %v367_v56 }
  0xc5   : > { %421 = vmatprep.subr.bf16.mxu1 %v370_v57  ;;  %464 = vmatprep.subr.bf16.mxu0 %v372_v58 }
  0xcc   : > { %422 = vmatpush1.bf16.xpose.msra.mxu1 %v369_v61  ;;  %465 = vmatpush1.bf16.xpose.msra.mxu0 %v371_v62 }
  0xcd   : > { %423 = vmatprep.subr.bf16.mxu1 %v374_v63  ;;  %466 = vmatprep.subr.bf16.mxu0 %v376_v0 }
  0xd4   : > { %424 = vmatpush1.bf16.xpose.msra.mxu1 %v373_v3  ;;  %467 = vmatpush1.bf16.xpose.msra.mxu0 %v375_v4  ;;  %v507_v3 = vld [vmem:[%s281_s20] sm:$0x3] (!%p690_p1) }
  0xd5   : > { %425 = vmatprep.subr.bf16.mxu1 %v378_v5  ;;  %468 = vmatprep.subr.bf16.mxu0 %v380_v6  ;;  %v511_v5 = vsub.s32 (!%p690_p1), 0, %v510_v2  ;;  %v515_v6 = vsub.s32 (!%p690_p1), 1, %v510_v2 }
  0xdc   : > { %426 = vmatpush1.bf16.xpose.msra.mxu1 %v377_v9  ;;  %469 = vmatpush1.bf16.xpose.msra.mxu0 %v379_v10  ;;  %v512_v10 = vrot.slane (!%p690_p1), %v507_v3, %v511_v5 }
  0xdd   : > { %427 = vmatprep.subr.bf16.mxu1 %v382_v11  ;;  %470 = vmatprep.subr.bf16.mxu0 %v384_v12  ;;  %v516_v11 = vrot.slane (!%p690_p1), %v507_v3, %v515_v6 }
  0xe4   : > { %428 = vmatpush1.bf16.xpose.msra.mxu1 %v381_v15  ;;  %471 = vmatpush1.bf16.xpose.msra.mxu0 %v383_v16 }
  0xe5   : > { %429 = vmatprep.subr.bf16.mxu1 %v386_v17  ;;  %472 = vmatprep.subr.bf16.mxu0 %v388_v18 }
  0xec   : > { %430 = vmatpush1.bf16.xpose.msra.mxu1 %v385_v21  ;;  %473 = vmatpush1.bf16.xpose.msra.mxu0 %v387_v22 }
  0xed   : > { %431 = vmatprep.subr.bf16.mxu1 %v390_v23  ;;  %474 = vmatprep.subr.bf16.mxu0 %v392_v24 }
  0xf4   : > { %432 = vmatpush1.bf16.xpose.msra.mxu1 %v389_v27  ;;  %475 = vmatpush1.bf16.xpose.msra.mxu0 %v391_v28 }
  0xf5   : > { %433 = vmatprep.subr.bf16.mxu1 %v394_v29  ;;  %476 = vmatprep.subr.bf16.mxu0 %v396_v30 }
  0xfc   : > { %434 = vmatpush1.bf16.xpose.msra.mxu1 %v393_v33  ;;  %477 = vmatpush1.bf16.xpose.msra.mxu0 %v395_v34 }
  0xfd   : > { %435 = vmatprep.subr.bf16.mxu1 %v398_v35  ;;  %478 = vmatprep.subr.bf16.mxu0 %v400_v36 }
 0x104   : > { %436 = vmatpush1.bf16.xpose.msra.mxu1 %v397_v37  ;;  %479 = vmatpush1.bf16.xpose.msra.mxu0 %v399_v38 }
 0x10b   : > { %438 = vmatmul.mubr.bf16.vlgmr.msra.gmra.mrb[0].mxu1 %v301_v43  ;;  %481 = vmatmul.mubr.bf16.vlgmr.msra.gmra.mrb[0].mxu0 %v303_v44 }
 0x1de   : > { %v439_v45 = vpop.f32.mrb[0].mxu1  ;;  %v482_v47 = vpop.f32.mrb[0].mxu0 }
 0x1df   : > { %v483_v48 = vadd.f32 %v482_v47, %v439_v45  ;;  %v441_v49 = vpop.f32.mrb[1].mxu1  ;;  %v484_v51 = vpop.f32.mrb[1].mxu0 }
 0x1e0   : > { %v485_v52 = vadd.f32 %v484_v51, %v441_v49  ;;  %v443_v53 = vpop.f32.mrb[2].mxu1  ;;  %v486_v55 = vpop.f32.mrb[2].mxu0  ;;  %502 = sbr.rel (%p690_p1) target bundleno = 497 (0x1f1), region = 48 }
 0x1e1   : > { %v491_v56 = vadd.f32 %v483_v48, %v401_v46  ;;  %v487_v57 = vadd.f32 %v486_v55, %v443_v53  ;;  %v445_v58 = vpop.f32.mrb[3].mxu1  ;;  %v488_v60 = vpop.f32.mrb[3].mxu0 }
 0x1e2   : > { %v492_v61 = vadd.f32 %v485_v52, %v402_v50  ;;  %v489_v62 = vadd.f32 %v488_v60, %v445_v58 }
 0x1e3   : > { %495 = vst [vmem:[%s1372_s10] sm:$0xff] %v491_v56  ;;  %v493_v63 = vadd.f32 %v487_v57, %v403_v54 }
 0x1e4   : > { %496 = vst [vmem:[%s1372_s10 + $0x8] sm:$0xff] %v492_v61  ;;  %v494_v0 = vadd.f32 %v489_v62, %v404_v59 }
 0x1e5   : > { %497 = vst [vmem:[%s1372_s10 + $0x10] sm:$0xff] %v493_v63 }
 0x1e6   : > { %498 = vst [vmem:[%s1372_s10 + $0x18] sm:$0xff] %v494_v0 }
 0x1ea   : > { %v503_v4 = vld [vmem:[%s1372_s10] sm:$0xff] }
 0x1eb   : > { %v504_v7 = vld [vmem:[%s1372_s10 + $0x8] sm:$0xff]  ;;  %v519_v12 = vmul.f32 %v512_v10, %v503_v4 }
 0x1ec   : > { %v505_v8 = vld [vmem:[%s1372_s10 + $0x10] sm:$0xff]  ;;  %v520_v13 = vmul.f32 %v516_v11, %v504_v7 }
 0x1ed   : > { %v506_v9 = vld [vmem:[%s1372_s10 + $0x18] sm:$0xff]  ;;  %v521_v14 = vmul.f32 %v512_v10, %v505_v8  ;;  %523 = vst [vmem:[%s1372_s10] sm:$0xff] %v519_v12 }
 0x1ee   : > { %v522_v15 = vmul.f32 %v516_v11, %v506_v9  ;;  %524 = vst [vmem:[%s1372_s10 + $0x8] sm:$0xff] %v520_v13 }
 0x1ef   : > { %525 = vst [vmem:[%s1372_s10 + $0x10] sm:$0xff] %v521_v14 }
 0x1f0   : > { %526 = vst [vmem:[%s1372_s10 + $0x18] sm:$0xff] %v522_v15 }
 0x1f1 PF: > { %s698_s6 = sshll.u32 %s1039_s22, 8  ;;  %s1577_s27 = sld [smem:[#allocation18_spill]] }
 0x1f2   : > { %s544_s0 = sshll.u32 %s1372_s10, 4  ;;  %s1452_s7 = scalar_lea.sflag [#allocation4], %s271_s9  ;;  %s1448_s0 = int_to_ptr.vmem [resolvable:$true] %s544_s0 }
 0x1f3   : > { %s901_s21 = scalar_lea.vmem %s1448_s0, 512  ;;  %p1578_p3 = scmp.ne.s32.totalorder %s1565_s5, 0 }
 0x1f4   : > { %p902_p6 = scmp.ne.s32.totalorder %s1448_s0, %s901_s21  ;;  %s1059_s22 = smov [#allocation7]  }
 0x1f5   : > { %s905_s11 = sshll.u32 %s1059_s22, 4  ;;  %s906_s11 = int_to_ptr.vmem [resolvable:$false] %s905_s11 }
 0x1f6   : > { %p903_p5 = pnand %p902_p6, %p1578_p3  ;;  %s907_s20 = scalar_lea.vmem %s906_s11, 1024 }
 0x1f7   : > { %s1445_s15 = scalar_lea.hbm %s1577_s27, %s698_s6  ;;  %p908_p11 = scmp.lt.s32.totalorder %s1448_s0, %s906_s11 }
 0x1f8   : > { %p904_p12 = pneg %p903_p5  ;;  %p909_p0 = scmp.lt.s32.totalorder %s907_s20, %s901_s21 }
 0x1fa   : > { %p910_p4 = por %p909_p0, %p908_p11 }
 0x1fc   : > { %p911_p9 = pnand %p910_p4, %p904_p12 }
 0x1fe   : > { %914 = shalt.err (!%p911_p9)
}
 0x1ff   : > { %s915_s9 = scalar_lea.hbm %s1445_s15, 512  ;;  %s919_s8 = scalar_lea.hbm %s1577_s27, 1024 }
 0x200   : > { %p916_p2 = scmp.ne.s32.totalorder %s1445_s15, %s915_s9  ;;  %p920_p8 = scmp.lt.u32.totalorder %s1445_s15, %s1577_s27 }
 0x201   : > { %p921_p10 = scmp.lt.u32.totalorder %s919_s8, %s915_s9  ;;  %p923_p6 = scmp.lt.u32.totalorder %s915_s9, %s1445_s15 }
 0x202   : > { %p917_p13 = pnand %p916_p2, %p1578_p3 }
 0x203   : > { %p922_p1 = por %p921_p10, %p920_p8 }
 0x204   : > { %p918_p7 = pneg %p917_p13 }
 0x205   : > { %p924_p5 = por %p923_p6, %p922_p1 }
 0x207   : > { %p925_p12 = pnand %p924_p5, %p918_p7 }
 0x209   : > { %928 = shalt.err (!%p925_p12)
}
 0x20a   : > { %s1060_s6 = smov 256   ;;  %s1061_s3 = smov 512  }
 0x20b   : > { %s1062_s18 = smov 16  }
 0x20c   : > { %707 = dma.vmem_to_hbm [thread:$0]  (%p1578_p3), %s1448_s0, 512, %s1445_s15, %s1452_s7, %s1060_s6, %s1061_s3, %s1062_s18  }
 0x20d PF: > { %p721_p11 = scmp.ge.s32.totalorder %s1051_s25, 2  ;;  %s559_s21 = sand.u32 1, %s999_s12  }
 0x20e   : > { %p1579_p0 = scmp.ne.s32.totalorder %s1567_s30, 0  ;;  %s560_s22 = scalar_lea.sflag [#allocation4], %s559_s21 }
 0x210   : > { %p717_p4 = pnand %p721_p11, %p1579_p0 }
 0x212   : > { %994 = dma.done.wait (!%p717_p4), %s560_s22, 512  }
 0x213   : > { %996 = vsyncadd (!%p717_p4), %s560_s22, 4294966784  ;;  %s22_s25 = sadd.s32 1, %s1051_s25   ;;  %s1581_s5 = sld [smem:[#allocation16_spill]] }
 0x214   : > { %p1481_p9 = scmp.ge.s32.totalorder %s22_s25, 6   ;;  %s1582_s0 = sld [smem:[#allocation11_spill]] }
 0x215   : > { %s1583_s20 = sld [smem:[#allocation14_spill]]  ;;  %s1584_s30 = sld [smem:[#allocation13_spill]] }
 0x216   : > { %s1585_s7 = sld [smem:[#allocation15_spill]]  ;;  %s1586_s12 = smov %s1003_s13 }
 0x217   : > { %s1587_s13 = smov %s1007_s14  ;;  %s1588_s14 = smov %s1288_s29 }
 0x218   : > { %s1589_s15 = smov %s1015_s16  ;;  %s1590_s16 = smov %s1019_s17 }
 0x219   : > { %s1591_s17 = smov %s1581_s5  ;;  %s1592_s18 = smov %s1027_s19 }
 0x21a   : > { %s1593_s19 = smov %s1582_s0  ;;  %s1594_s21 = smov %s1043_s23 }
 0x21b   : > { %s1595_s22 = smov %s1047_s24  ;;  %s1596_s23 = smov %s1584_s30 }
 0x21c   : > { %s1597_s24 = smov %s1585_s7  ;;  %21 = sbr.rel (!%p1481_p9) target bundleno = 15 (0xf), region = 101 }
 0x223   :  { %565 = vsyncpa [#allocation3], 1 }
 0x224   :  { %567 = vsyncpa [#allocation3 + $0x1], 1 }
 0x225   :  { %568 = vsyncpa [#allocation6], 1 }
 0x226   :  { %570 = vsyncpa [#allocation6 + $0x1], 1 }
 0x227   :  { %571 = vsyncpa [#allocation4], 1 }
 0x228   :  { %573 = vsyncpa [#allocation4 + $0x1], 1 }

</bundles_post_ra>
